<compile_context>
chip_gen: v7x
topology: tpu7x:2x2x1
jax: 0.10.0
libtpu: 0.0.40
codegen_flags: <defaults>
</compile_context>

<pallas_src>
import functools

import jax
import jax.numpy as jnp
from jax.experimental import pallas as pl
from jax.experimental.pallas import tpu as pltpu


def _round_up(x, m):
    return ((x + m - 1) // m) * m


# ---------------------------------------------------------------------------
# Kernels
# ---------------------------------------------------------------------------

def _smearing_ng_kernel(offset_ref, dist_ref, out_ref, *, coeff):
    """Direct (N, G) layout: single HBM write pass, no post-kernel transpose.

    offset_ref: (1, G)      tiny resident row of gaussian centres
    dist_ref:   (TILE, 1)   column of distances (contiguous HBM read)
    out_ref:    (TILE, G)   output tile in the torch (N, G) layout
    """
    diff = dist_ref[...] - offset_ref[...]                 # (TILE, G) broadcast
    out_ref[...] = jnp.exp(coeff * diff * diff).astype(out_ref.dtype)


def _smearing_gn_kernel(offset_ref, dist_ref, out_ref, *, coeff):
    """Transposed (G, N) layout: fully lane-dense stores, for fusion consumers.

    offset_ref: (G, 1)      column of gaussian centres (broadcast along lanes)
    dist_ref:   (1, TILE)   lane-dense row of distances
    out_ref:    (G, TILE)
    """
    diff = dist_ref[...] - offset_ref[...]                 # (G, TILE) broadcast
    out_ref[...] = jnp.exp(coeff * diff * diff).astype(out_ref.dtype)


# ---------------------------------------------------------------------------
# Reference + wrapper
# ---------------------------------------------------------------------------

def _gaussian_smearing_ref(dist_flat, offset, coeff):
    d = dist_flat.reshape(-1, 1) - offset.reshape(1, -1)
    return jnp.exp(coeff * d * d)


def gaussian_smearing(dist, *, start=0.0, stop=5.0, num_gaussians=50,
                      tile_n=8192, min_kernel_rows=512,
                      out_dtype=jnp.float32, transpose_output=False):
    """Pallas GaussianSmearing forward.

    Default returns (N, num_gaussians) (torch contract), computed directly in
    that layout (no XLA transpose pass).  transpose_output=True returns the
    lane-dense (num_gaussians, N) slab for consumers that can fuse/absorb the
    transposed layout downstream (e.g. into a matmul's dimension_numbers).
    """
    assert num_gaussians >= 2, "num_gaussians must be >= 2 (step would be 0)"

    dist_flat = jnp.asarray(dist, jnp.float32).reshape(-1)
    n = dist_flat.shape[0]
    g = num_gaussians
    step = (stop - start) / (num_gaussians - 1)
    coeff = -0.5 / step ** 2
    offset = jnp.linspace(start, stop, num_gaussians, dtype=jnp.float32)

    # Tiny inputs: pallas_call fixed cost dominates; plain XLA is faster.
    if n < min_kernel_rows:
        out = _gaussian_smearing_ref(dist_flat, offset, coeff).astype(out_dtype)
        return out.T if transpose_output else out

    compiler_params = pltpu.CompilerParams(
        dimension_semantics=("parallel",),
        vmem_limit_bytes=32 * 1024 * 1024,
    )

    if transpose_output:
        # Lane-dense (G, N) slab.  tile is a lane multiple; keep >= 4 grid
        # steps so each v7x TensorCore still pipelines >= 2 steps.
        kernel = functools.partial(_smearing_gn_kernel, coeff=float(coeff))
        tile = _round_up(max(tile_n, 128), 128)
        tile = max(128, min(tile, _round_up(pl.cdiv(n, 4), 128)))
        grid = (pl.cdiv(n, tile),)
        return pl.pallas_call(
            kernel,
            out_shape=jax.ShapeDtypeStruct((g, n), out_dtype),
            grid_spec=pltpu.PrefetchScalarGridSpec(
                num_scalar_prefetch=0,
                grid=grid,
                in_specs=[pl.BlockSpec((g, 1), lambda i: (0, 0)),
                          pl.BlockSpec((1, tile), lambda i: (0, i))],
                out_specs=pl.BlockSpec((g, tile), lambda i: (0, i)),
            ),
            compiler_params=compiler_params,
        )(offset.reshape(g, 1), dist_flat.reshape(1, n))

    # Direct (N, G) layout.  tile rows on sublanes (multiple of 8); keep >= 4
    # grid steps (>= 2 per v7x core) so the edge DMAs stay hidden.
    kernel = functools.partial(_smearing_ng_kernel, coeff=float(coeff))
    tile = _round_up(max(tile_n, 8), 8)
    tile = max(8, min(tile, _round_up(pl.cdiv(n, 4), 8)))
    grid = (pl.cdiv(n, tile),)
    return pl.pallas_call(
        kernel,
        out_shape=jax.ShapeDtypeStruct((n, g), out_dtype),
        grid_spec=pltpu.PrefetchScalarGridSpec(
            num_scalar_prefetch=0,
            grid=grid,
            in_specs=[pl.BlockSpec((1, g), lambda i: (0, 0)),
                      pl.BlockSpec((tile, 1), lambda i: (i, 0))],
            out_specs=pl.BlockSpec((tile, g), lambda i: (i, 0)),
        ),
        compiler_params=compiler_params,
    )(offset.reshape(1, g), dist_flat.reshape(n, 1))


if __name__ == "__main__":
    key = jax.random.PRNGKey(0)
    # Small edge-distance vector, large enough to take the Pallas kernel path.
    n_edges = 2048
    dist = jax.random.uniform(key, (n_edges,), dtype=jnp.float32) * 5.0

    start, stop, num_gaussians = 0.0, 5.0, 50
    step = (stop - start) / (num_gaussians - 1)
    coeff = -0.5 / step ** 2
    offset = jnp.linspace(start, stop, num_gaussians, dtype=jnp.float32)
    ref = _gaussian_smearing_ref(dist, offset, coeff)

    # Default torch-contract path: (N, G), computed directly (no transpose pass).
    out = gaussian_smearing(dist, start=start, stop=stop,
                            num_gaussians=num_gaussians)
    out = jax.block_until_ready(out)
    assert out.shape == (n_edges, num_gaussians), out.shape
    assert bool(jnp.all(jnp.isfinite(out)))
    assert jnp.allclose(out, ref, atol=1e-5, rtol=1e-5), "mismatch vs reference (N,G)"

    # Fusion-friendly lane-dense (G, N) slab (no XLA transpose anywhere).
    out_gn = gaussian_smearing(dist, start=start, stop=stop,
                               num_gaussians=num_gaussians,
                               transpose_output=True)
    out_gn = jax.block_until_ready(out_gn)
    assert out_gn.shape == (num_gaussians, n_edges), out_gn.shape
    assert jnp.allclose(out_gn, ref.T, atol=1e-5, rtol=1e-5), "mismatch vs reference (G,N)"

    print("KERNEL_OK")
</pallas_src>

<mosaic_0001>
module attributes {stable_mosaic.version = 11 : i64} {
  func.func @_smearing_ng_kernel(%arg0: i32, %arg1: memref<1x50xf32, #tpu.memory_space<vmem>>, %arg2: memref<512x1xf32, #tpu.memory_space<vmem>>, %arg3: memref<512x50xf32, #tpu.memory_space<vmem>>) attributes {dimension_semantics = [#tpu.dimension_semantics<parallel>], iteration_bounds = array<i64: 4>, scalar_prefetch = 0 : i64, scratch_operands = 0 : i64, tpu.core_type = #tpu.core_type<tc>, window_params = [{pipeline_mode = #tpu.pipeline_mode<synchronous>, transform_indices = @transform_0, window_bounds = array<i64: 1, 50>}, {transform_indices = @transform_1, window_bounds = array<i64: 512, 1>}, {transform_indices = @transform_2, window_bounds = array<i64: 512, 50>}]} {
    %c0 = arith.constant 0 : index
    %c0_0 = arith.constant 0 : index
    %0 = vector.load %arg2[%c0, %c0_0] : memref<512x1xf32, #tpu.memory_space<vmem>>, vector<512x1xf32>
    %c0_1 = arith.constant 0 : index
    %c0_2 = arith.constant 0 : index
    %1 = vector.load %arg1[%c0_1, %c0_2] : memref<1x50xf32, #tpu.memory_space<vmem>>, vector<1x50xf32>
    %2 = vector.broadcast %0 : vector<512x1xf32> to vector<512x50xf32>
    %3 = vector.broadcast %1 : vector<1x50xf32> to vector<512x50xf32>
    %4 = arith.subf %2, %3 : vector<512x50xf32>
    %cst = arith.constant -4.802000e+01 : f32
    %5 = vector.broadcast %cst : f32 to vector<512x50xf32>
    %6 = arith.mulf %5, %4 : vector<512x50xf32>
    %7 = arith.mulf %6, %4 : vector<512x50xf32>
    %8 = math.exp %7 : vector<512x50xf32>
    %c0_3 = arith.constant 0 : index
    %c0_4 = arith.constant 0 : index
    %9 = vector.load %arg3[%c0_3, %c0_4] : memref<512x50xf32, #tpu.memory_space<vmem>>, vector<512x50xf32>
    tpu.vector_store %arg3[%c0_3, %c0_4], %8 {strides = array<i32>} : memref<512x50xf32, #tpu.memory_space<vmem>>, vector<512x50xf32>,
    return
  }
  func.func @transform_0(%arg0: i32) -> (i32, i32) {
    %c0_i32 = arith.constant 0 : i32
    %c0_i32_0 = arith.constant 0 : i32
    %c0_i32_1 = arith.constant 0 : i32
    return %c0_i32, %c0_i32_0 : i32, i32
  }
  func.func @transform_1(%arg0: i32) -> (i32, i32) {
    %c0_i32 = arith.constant 0 : i32
    %c0_i32_0 = arith.constant 0 : i32
    return %arg0, %c0_i32 : i32, i32
  }
  func.func @transform_2(%arg0: i32) -> (i32, i32) {
    %c0_i32 = arith.constant 0 : i32
    %c0_i32_0 = arith.constant 0 : i32
    return %arg0, %c0_i32 : i32, i32
  }
}

</mosaic_0001>

<bundles_post_ra>
// kernel: tpu_custom_call.1
= control target key start
LH: loop header
LB: loop body
LE: loop exit
PB: predicated region body
PF: predicated region fallthrough
CT: control target
= control target key end

     0   :  { %s1154_s9 = smov 0   ;;  %s1443_s0 = inlined_call_operand.vmem [shape: f32[1,50], index: 0, kind: input, shape index: {}]   ;;  %s1444_s1 = inlined_call_operand.vmem [shape: f32[2048,1], index: 1, kind: input, shape index: {}]   ;;  %s1445_s2 = inlined_call_operand.vmem [shape: f32[2048,50], index: 2, kind: output, shape index: {}]  }
   0x1 LB: > { %s979_s10 = sadd.s32 4294967295, %s1136_s9   ;;  %p983_p0 = scmp.ge.s32.totalorder %s1136_s9, 1  ;;  %s1136_s9 = sphi %s1154_s9, %s12_s9  }
   0x2   : > { %p113_p1 = scmp.lt.s32.totalorder %s1136_s9, 5 }
   0x4   : > { %p114_p2 = pnand %p983_p0, %p113_p1 }
   0x5   : > { %s984_s11 = sshll.u32 (!%p114_p2), %s979_s10, 6  ;;  %v1138_v0 = vmov (!%p114_p2), 0   ;;  %vm858_vm0 = vcmask (!%p114_p2), 408576  }
   0x6   : > { %117 = sbr.rel (%p114_p2) target bundleno = 290 (0x122), region = 28  ;;  %1001 = vset.pattern.permute.xlu1 (!%p114_p2), %v1138_v0  ;;  %1000 = vset.pattern.permute.xlu0 (!%p114_p2), %v1138_v0  ;;  %p136_p3 = scmp.lt.s32.totalorder (!%p114_p2), %s984_s11, 255 }
   0xd   : > { %s1447_s11 = smov (!%p136_p3, %s984_s11), 255 }
   0xe   : > { %s985_s12 = sshll.u32 %s1447_s11, 3 }
   0xf   : > { %s1170_s15 = scalar_lea.vmem %s1444_s1, %s985_s12  ;;  %s1254_s20 = scalar_lea.vmem %s1445_s2, %s985_s12 }
  0x10   : > { %v149_v1 = vld [vmem:[%s1170_s15 + $0x10] sm:$0xff]  ;;  %v147_v2 = vld [vmem:[%s1170_s15] sm:$0xff]  ;;  %v150_v3 = vld [vmem:[%s1170_s15 + $0x18] sm:$0xff] }
  0x11   : > { %224 = vperm.xlu1 %1001, %v149_v1   ;;  %214 = vperm.xlu0 %1000, %v147_v2   ;;  %v148_v4 = vld [vmem:[%s1170_s15 + $0x8] sm:$0xff]  ;;  %v151_v6 = vld [vmem:[%s1170_s15 + $0x20] sm:$0xff]  ;;  %v154_v7 = vld [vmem:[%s1170_s15 + $0x38] sm:$0xff] }
  0x12   : > { %v152_v5 = vld [vmem:[%s1170_s15 + $0x28] sm:$0xff]  ;;  %v153_v8 = vld [vmem:[%s1170_s15 + $0x30] sm:$0xff]  ;;  %v155_v10 = vld [vmem:[%s1170_s15 + $0x40] sm:$0xff] }
  0x13   : > { %v156_v9 = vld [vmem:[%s1170_s15 + $0x48] sm:$0xff]  ;;  %v158_v11 = vld [vmem:[%s1170_s15 + $0x58] sm:$0xff]  ;;  %v157_v12 = vld [vmem:[%s1170_s15 + $0x50] sm:$0xff] }
  0x14   : > { %v160_v13 = vld [vmem:[%s1170_s15 + $0x68] sm:$0xff]  ;;  %v159_v14 = vld [vmem:[%s1170_s15 + $0x60] sm:$0xff]  ;;  %v162_v15 = vld [vmem:[%s1170_s15 + $0x78] sm:$0xff] }
  0x15   : > { %229 = vperm.xlu1 %1001, %v150_v3   ;;  %219 = vperm.xlu0 %1000, %v148_v4   ;;  %v161_v16 = vld [vmem:[%s1170_s15 + $0x70] sm:$0xff]  ;;  %v164_v17 = vld [vmem:[%s1170_s15 + $0x88] sm:$0xff]  ;;  %v163_v18 = vld [vmem:[%s1170_s15 + $0x80] sm:$0xff] }
  0x16   : > { %v166_v19 = vld [vmem:[%s1170_s15 + $0x98] sm:$0xff]  ;;  %v165_v20 = vld [vmem:[%s1170_s15 + $0x90] sm:$0xff]  ;;  %v168_v21 = vld [vmem:[%s1170_s15 + $0xa8] sm:$0xff] }
  0x17   : > { %v167_v22 = vld [vmem:[%s1170_s15 + $0xa0] sm:$0xff]  ;;  %v170_v23 = vld [vmem:[%s1170_s15 + $0xb8] sm:$0xff]  ;;  %v169_v24 = vld [vmem:[%s1170_s15 + $0xb0] sm:$0xff] }
  0x18   : > { %v172_v25 = vld [vmem:[%s1170_s15 + $0xc8] sm:$0xff]  ;;  %v171_v26 = vld [vmem:[%s1170_s15 + $0xc0] sm:$0xff]  ;;  %v174_v27 = vld [vmem:[%s1170_s15 + $0xd8] sm:$0xff] }
  0x19   : > { %239 = vperm.xlu1 %1001, %v152_v5   ;;  %234 = vperm.xlu0 %1000, %v151_v6   ;;  %v173_v28 = vld [vmem:[%s1170_s15 + $0xd0] sm:$0xff]  ;;  %v176_v29 = vld [vmem:[%s1170_s15 + $0xe8] sm:$0xff]  ;;  %v175_v30 = vld [vmem:[%s1170_s15 + $0xe0] sm:$0xff] }
  0x1a   : > { %v178_v31 = vld [vmem:[%s1170_s15 + $0xf8] sm:$0xff]  ;;  %v177_v32 = vld [vmem:[%s1170_s15 + $0xf0] sm:$0xff]  ;;  %v180_v33 = vld [vmem:[%s1170_s15 + $0x108] sm:$0xff] }
  0x1b   : > { %v179_v34 = vld [vmem:[%s1170_s15 + $0x100] sm:$0xff]  ;;  %v182_v35 = vld [vmem:[%s1170_s15 + $0x118] sm:$0xff]  ;;  %v181_v36 = vld [vmem:[%s1170_s15 + $0x110] sm:$0xff] }
  0x1c   : > { %v184_v37 = vld [vmem:[%s1170_s15 + $0x128] sm:$0xff]  ;;  %v183_v38 = vld [vmem:[%s1170_s15 + $0x120] sm:$0xff]  ;;  %v186_v39 = vld [vmem:[%s1170_s15 + $0x138] sm:$0xff] }
  0x1d   : > { %249 = vperm.xlu1 %1001, %v154_v7   ;;  %244 = vperm.xlu0 %1000, %v153_v8   ;;  %v185_v40 = vld [vmem:[%s1170_s15 + $0x130] sm:$0xff]  ;;  %v188_v41 = vld [vmem:[%s1170_s15 + $0x148] sm:$0xff]  ;;  %v187_v42 = vld [vmem:[%s1170_s15 + $0x140] sm:$0xff] }
  0x1e   : > { %v190_v43 = vld [vmem:[%s1170_s15 + $0x158] sm:$0xff]  ;;  %v189_v44 = vld [vmem:[%s1170_s15 + $0x150] sm:$0xff]  ;;  %v192_v45 = vld [vmem:[%s1170_s15 + $0x168] sm:$0xff] }
  0x1f   : > { %v191_v46 = vld [vmem:[%s1170_s15 + $0x160] sm:$0xff]  ;;  %v194_v47 = vld [vmem:[%s1170_s15 + $0x178] sm:$0xff]  ;;  %v193_v48 = vld [vmem:[%s1170_s15 + $0x170] sm:$0xff] }
  0x20   : > { %v196_v49 = vld [vmem:[%s1170_s15 + $0x188] sm:$0xff]  ;;  %v195_v50 = vld [vmem:[%s1170_s15 + $0x180] sm:$0xff]  ;;  %v198_v51 = vld [vmem:[%s1170_s15 + $0x198] sm:$0xff] }
  0x21   : > { %259 = vperm.xlu1 %1001, %v156_v9   ;;  %254 = vperm.xlu0 %1000, %v155_v10   ;;  %v197_v52 = vld [vmem:[%s1170_s15 + $0x190] sm:$0xff]  ;;  %v200_v53 = vld [vmem:[%s1170_s15 + $0x1a8] sm:$0xff]  ;;  %v199_v54 = vld [vmem:[%s1170_s15 + $0x1a0] sm:$0xff] }
  0x22   : > { %v202_v55 = vld [vmem:[%s1170_s15 + $0x1b8] sm:$0xff]  ;;  %v201_v56 = vld [vmem:[%s1170_s15 + $0x1b0] sm:$0xff]  ;;  %v204_v57 = vld [vmem:[%s1170_s15 + $0x1c8] sm:$0xff] }
  0x23   : > { %v203_v58 = vld [vmem:[%s1170_s15 + $0x1c0] sm:$0xff]  ;;  %v206_v59 = vld [vmem:[%s1170_s15 + $0x1d8] sm:$0xff]  ;;  %v205_v60 = vld [vmem:[%s1170_s15 + $0x1d0] sm:$0xff] }
  0x24   : > { %v208_v61 = vld [vmem:[%s1170_s15 + $0x1e8] sm:$0xff]  ;;  %v207_v62 = vld [vmem:[%s1170_s15 + $0x1e0] sm:$0xff]  ;;  %v210_v63 = vld [vmem:[%s1170_s15 + $0x1f8] sm:$0xff] }
  0x25   : > { %269 = vperm.xlu1 %1001, %v158_v11   ;;  %264 = vperm.xlu0 %1000, %v157_v12   ;;  %v209_v0 = vld [vmem:[%s1170_s15 + $0x1f0] sm:$0xff]  ;;  %v1239_v1 = vld [vmem:[%s1443_s0] ss:$0 sm:$0xff] }
  0x29   : > { %279 = vperm.xlu1 %1001, %v160_v13   ;;  %274 = vperm.xlu0 %1000, %v159_v14  }
  0x2d   : > { %289 = vperm.xlu1 %1001, %v162_v15   ;;  %284 = vperm.xlu0 %1000, %v161_v16  }
  0x31   : > { %299 = vperm.xlu1 %1001, %v164_v17   ;;  %294 = vperm.xlu0 %1000, %v163_v18  }
  0x35   : > { %309 = vperm.xlu1 %1001, %v166_v19   ;;  %304 = vperm.xlu0 %1000, %v165_v20  }
  0x39   : > { %319 = vperm.xlu1 %1001, %v168_v21   ;;  %314 = vperm.xlu0 %1000, %v167_v22  }
  0x3d   : > { %329 = vperm.xlu1 %1001, %v170_v23   ;;  %324 = vperm.xlu0 %1000, %v169_v24  }
  0x41   : > { %339 = vperm.xlu1 %1001, %v172_v25   ;;  %334 = vperm.xlu0 %1000, %v171_v26  }
  0x45   : > { %349 = vperm.xlu1 %1001, %v174_v27   ;;  %344 = vperm.xlu0 %1000, %v173_v28  }
  0x49   : > { %359 = vperm.xlu1 %1001, %v176_v29   ;;  %354 = vperm.xlu0 %1000, %v175_v30  }
  0x4d   : > { %369 = vperm.xlu1 %1001, %v178_v31   ;;  %364 = vperm.xlu0 %1000, %v177_v32  }
  0x51   : > { %379 = vperm.xlu1 %1001, %v180_v33   ;;  %374 = vperm.xlu0 %1000, %v179_v34  }
  0x55   : > { %389 = vperm.xlu1 %1001, %v182_v35   ;;  %384 = vperm.xlu0 %1000, %v181_v36  }
  0x59   : > { %399 = vperm.xlu1 %1001, %v184_v37   ;;  %394 = vperm.xlu0 %1000, %v183_v38  }
  0x5d   : > { %409 = vperm.xlu1 %1001, %v186_v39   ;;  %404 = vperm.xlu0 %1000, %v185_v40  }
  0x61   : > { %419 = vperm.xlu1 %1001, %v188_v41   ;;  %414 = vperm.xlu0 %1000, %v187_v42  }
  0x65   : > { %429 = vperm.xlu1 %1001, %v190_v43   ;;  %424 = vperm.xlu0 %1000, %v189_v44  }
  0x69   : > { %439 = vperm.xlu1 %1001, %v192_v45   ;;  %434 = vperm.xlu0 %1000, %v191_v46  }
  0x6d   : > { %449 = vperm.xlu1 %1001, %v194_v47   ;;  %444 = vperm.xlu0 %1000, %v193_v48  }
  0x71   : > { %459 = vperm.xlu1 %1001, %v196_v49   ;;  %454 = vperm.xlu0 %1000, %v195_v50  }
  0x75   : > { %469 = vperm.xlu1 %1001, %v198_v51   ;;  %464 = vperm.xlu0 %1000, %v197_v52  }
  0x79   : > { %479 = vperm.xlu1 %1001, %v200_v53   ;;  %474 = vperm.xlu0 %1000, %v199_v54  }
  0x7d   : > { %489 = vperm.xlu1 %1001, %v202_v55   ;;  %484 = vperm.xlu0 %1000, %v201_v56  }
  0x81   : > { %499 = vperm.xlu1 %1001, %v204_v57   ;;  %494 = vperm.xlu0 %1000, %v203_v58  }
  0x85   : > { %509 = vperm.xlu1 %1001, %v206_v59   ;;  %504 = vperm.xlu0 %1000, %v205_v60  }
  0x89   : > { %519 = vperm.xlu1 %1001, %v208_v61   ;;  %514 = vperm.xlu0 %1000, %v207_v62  }
  0x8d   : > { %529 = vperm.xlu1 %1001, %v210_v63   ;;  %524 = vperm.xlu0 %1000, %v209_v0  }
  0x90   : > { %v225_v2 = vpop.permute.xlu1 %224  ;;  %v215_v3 = vpop.permute.xlu0 %214 }
  0x91   : > { %v540_v4 = vsub.f32 %v225_v2, %v1239_v1  ;;  %v538_v5 = vsub.f32 %v215_v3, %v1239_v1 }
  0x93   : > { %v604_v6 = vmul.f32 -48.02, %v540_v4  ;;  %v602_v7 = vmul.f32 -48.02, %v538_v5 }
  0x94   : > { %v230_v8 = vpop.permute.xlu1 %229  ;;  %v220_v9 = vpop.permute.xlu0 %219 }
  0x95   : > { %v668_v10 = vmul.f32 %v604_v6, %v540_v4  ;;  %v666_v11 = vmul.f32 %v602_v7, %v538_v5  ;;  %v541_v12 = vsub.f32 %v230_v8, %v1239_v1  ;;  %v539_v13 = vsub.f32 %v220_v9, %v1239_v1 }
  0x97   : > { %v734_v14 = vmul.f32 1.442695, %v668_v10  ;;  %v730_v15 = vmul.f32 1.442695, %v666_v11  ;;  %v605_v16 = vmul.f32 -48.02, %v541_v12 }
  0x98   : > { %v603_v17 = vmul.f32 -48.02, %v539_v13  ;;  %v240_v18 = vpop.permute.xlu1 %239  ;;  %v235_v19 = vpop.permute.xlu0 %234 }
  0x99   : > { %1002 = vpow2.f32 %v734_v14  ;;  %v669_v20 = vmul.f32 %v605_v16, %v541_v12  ;;  %v543_v21 = vsub.f32 %v240_v18, %v1239_v1  ;;  %v542_v22 = vsub.f32 %v235_v19, %v1239_v1 }
  0x9a   : > { %1004 = vpow2.f32 %v730_v15  ;;  %v667_v23 = vmul.f32 %v603_v17, %v539_v13 }
  0x9b   : > { %v736_v24 = vmul.f32 1.442695, %v669_v20  ;;  %v607_v25 = vmul.f32 -48.02, %v543_v21  ;;  %v606_v26 = vmul.f32 -48.02, %v542_v22 }
  0x9c   : > { %v732_v27 = vmul.f32 1.442695, %v667_v23  ;;  %v250_v28 = vpop.permute.xlu1 %249  ;;  %v245_v29 = vpop.permute.xlu0 %244 }
  0x9d   : > { %1006 = vpow2.f32 %v736_v24  ;;  %v671_v30 = vmul.f32 %v607_v25, %v543_v21  ;;  %v670_v31 = vmul.f32 %v606_v26, %v542_v22  ;;  %v545_v32 = vsub.f32 %v250_v28, %v1239_v1 }
  0x9e   : > { %1008 = vpow2.f32 %v732_v27  ;;  %v544_v33 = vsub.f32 %v245_v29, %v1239_v1 }
  0x9f   : > { %v740_v34 = vmul.f32 1.442695, %v671_v30  ;;  %v738_v35 = vmul.f32 1.442695, %v670_v31  ;;  %v609_v36 = vmul.f32 -48.02, %v545_v32 }
  0xa0   : > { %v608_v37 = vmul.f32 -48.02, %v544_v33  ;;  %v260_v38 = vpop.permute.xlu1 %259  ;;  %v255_v39 = vpop.permute.xlu0 %254 }
  0xa1   : > { %1010 = vpow2.f32 %v740_v34  ;;  %v673_v40 = vmul.f32 %v609_v36, %v545_v32  ;;  %v547_v41 = vsub.f32 %v260_v38, %v1239_v1  ;;  %v546_v42 = vsub.f32 %v255_v39, %v1239_v1 }
  0xa2   : > { %1012 = vpow2.f32 %v738_v35  ;;  %v672_v43 = vmul.f32 %v608_v37, %v544_v33 }
  0xa3   : > { %v1003_v44 = vpop.eup %1002  ;;  %v744_v45 = vmul.f32 1.442695, %v673_v40  ;;  %v611_v46 = vmul.f32 -48.02, %v547_v41  ;;  %v610_v47 = vmul.f32 -48.02, %v546_v42 }
  0xa4   : > { %v1005_v48 = vpop.eup %1004  ;;  %861 = vst.msk [vmem:[%s1254_s20 + $0x10] sm:$0xff] %vm858_vm0, %v1003_v44  ;;  %v742_v49 = vmul.f32 1.442695, %v672_v43  ;;  %v270_v50 = vpop.permute.xlu1 %269 }
  0xa5   : > { %v265_v51 = vpop.permute.xlu0 %264  ;;  %859 = vst.msk [vmem:[%s1254_s20] sm:$0xff] %vm858_vm0, %v1005_v48  ;;  %1014 = vpow2.f32 %v744_v45  ;;  %v675_v52 = vmul.f32 %v611_v46, %v547_v41  ;;  %v674_v53 = vmul.f32 %v610_v47, %v546_v42  ;;  %v549_v54 = vsub.f32 %v270_v50, %v1239_v1 }
  0xa6   : > { %1016 = vpow2.f32 %v742_v49  ;;  %v548_v55 = vsub.f32 %v265_v51, %v1239_v1 }
  0xa7   : > { %v1007_v56 = vpop.eup %1006  ;;  %v748_v57 = vmul.f32 1.442695, %v675_v52  ;;  %v746_v58 = vmul.f32 1.442695, %v674_v53  ;;  %v613_v59 = vmul.f32 -48.02, %v549_v54 }
  0xa8   : > { %v1009_v60 = vpop.eup %1008  ;;  %862 = vst.msk [vmem:[%s1254_s20 + $0x18] sm:$0xff] %vm858_vm0, %v1007_v56  ;;  %v612_v61 = vmul.f32 -48.02, %v548_v55  ;;  %v280_v62 = vpop.permute.xlu1 %279 }
  0xa9   : > { %v275_v63 = vpop.permute.xlu0 %274  ;;  %860 = vst.msk [vmem:[%s1254_s20 + $0x8] sm:$0xff] %vm858_vm0, %v1009_v60  ;;  %1018 = vpow2.f32 %v748_v57  ;;  %v677_v0 = vmul.f32 %v613_v59, %v549_v54  ;;  %v551_v2 = vsub.f32 %v280_v62, %v1239_v1 }
  0xaa   : > { %v550_v3 = vsub.f32 %v275_v63, %v1239_v1  ;;  %1020 = vpow2.f32 %v746_v58  ;;  %v676_v4 = vmul.f32 %v612_v61, %v548_v55 }
  0xab   : > { %v1011_v5 = vpop.eup %1010  ;;  %v752_v6 = vmul.f32 1.442695, %v677_v0  ;;  %v615_v7 = vmul.f32 -48.02, %v551_v2 }
  0xac   : > { %v614_v8 = vmul.f32 -48.02, %v550_v3  ;;  %v1013_v9 = vpop.eup %1012  ;;  %864 = vst.msk [vmem:[%s1254_s20 + $0x28] sm:$0xff] %vm858_vm0, %v1011_v5  ;;  %v750_v10 = vmul.f32 1.442695, %v676_v4  ;;  %v290_v11 = vpop.permute.xlu1 %289 }
  0xad   : > { %v285_v12 = vpop.permute.xlu0 %284  ;;  %863 = vst.msk [vmem:[%s1254_s20 + $0x20] sm:$0xff] %vm858_vm0, %v1013_v9  ;;  %1022 = vpow2.f32 %v752_v6  ;;  %v679_v13 = vmul.f32 %v615_v7, %v551_v2  ;;  %v553_v15 = vsub.f32 %v290_v11, %v1239_v1 }
  0xae   : > { %v678_v14 = vmul.f32 %v614_v8, %v550_v3  ;;  %1024 = vpow2.f32 %v750_v10  ;;  %v552_v16 = vsub.f32 %v285_v12, %v1239_v1 }
  0xaf   : > { %v1015_v17 = vpop.eup %1014  ;;  %v756_v18 = vmul.f32 1.442695, %v679_v13  ;;  %v617_v20 = vmul.f32 -48.02, %v553_v15 }
  0xb0   : > { %v754_v19 = vmul.f32 1.442695, %v678_v14  ;;  %v1017_v21 = vpop.eup %1016  ;;  %866 = vst.msk [vmem:[%s1254_s20 + $0x38] sm:$0xff] %vm858_vm0, %v1015_v17  ;;  %v616_v22 = vmul.f32 -48.02, %v552_v16  ;;  %v300_v23 = vpop.permute.xlu1 %299 }
  0xb1   : > { %v295_v24 = vpop.permute.xlu0 %294  ;;  %865 = vst.msk [vmem:[%s1254_s20 + $0x30] sm:$0xff] %vm858_vm0, %v1017_v21  ;;  %1026 = vpow2.f32 %v756_v18  ;;  %v681_v25 = vmul.f32 %v617_v20, %v553_v15  ;;  %v555_v26 = vsub.f32 %v300_v23, %v1239_v1 }
  0xb2   : > { %v554_v27 = vsub.f32 %v295_v24, %v1239_v1  ;;  %1028 = vpow2.f32 %v754_v19  ;;  %v680_v28 = vmul.f32 %v616_v22, %v552_v16 }
  0xb3   : > { %v1019_v29 = vpop.eup %1018  ;;  %v760_v30 = vmul.f32 1.442695, %v681_v25  ;;  %v619_v31 = vmul.f32 -48.02, %v555_v26 }
  0xb4   : > { %v618_v32 = vmul.f32 -48.02, %v554_v27  ;;  %v1021_v33 = vpop.eup %1020  ;;  %868 = vst.msk [vmem:[%s1254_s20 + $0x48] sm:$0xff] %vm858_vm0, %v1019_v29  ;;  %v758_v34 = vmul.f32 1.442695, %v680_v28  ;;  %v310_v35 = vpop.permute.xlu1 %309 }
  0xb5   : > { %v305_v36 = vpop.permute.xlu0 %304  ;;  %867 = vst.msk [vmem:[%s1254_s20 + $0x40] sm:$0xff] %vm858_vm0, %v1021_v33  ;;  %1030 = vpow2.f32 %v760_v30  ;;  %v683_v37 = vmul.f32 %v619_v31, %v555_v26  ;;  %v557_v39 = vsub.f32 %v310_v35, %v1239_v1 }
  0xb6   : > { %v682_v38 = vmul.f32 %v618_v32, %v554_v27  ;;  %1032 = vpow2.f32 %v758_v34  ;;  %v556_v40 = vsub.f32 %v305_v36, %v1239_v1 }
  0xb7   : > { %v1023_v41 = vpop.eup %1022  ;;  %v764_v42 = vmul.f32 1.442695, %v683_v37  ;;  %v621_v44 = vmul.f32 -48.02, %v557_v39 }
  0xb8   : > { %v762_v43 = vmul.f32 1.442695, %v682_v38  ;;  %v1025_v45 = vpop.eup %1024  ;;  %870 = vst.msk [vmem:[%s1254_s20 + $0x58] sm:$0xff] %vm858_vm0, %v1023_v41  ;;  %v620_v46 = vmul.f32 -48.02, %v556_v40  ;;  %v320_v47 = vpop.permute.xlu1 %319 }
  0xb9   : > { %v315_v48 = vpop.permute.xlu0 %314  ;;  %869 = vst.msk [vmem:[%s1254_s20 + $0x50] sm:$0xff] %vm858_vm0, %v1025_v45  ;;  %1034 = vpow2.f32 %v764_v42  ;;  %v685_v49 = vmul.f32 %v621_v44, %v557_v39  ;;  %v559_v50 = vsub.f32 %v320_v47, %v1239_v1 }
  0xba   : > { %v558_v51 = vsub.f32 %v315_v48, %v1239_v1  ;;  %1036 = vpow2.f32 %v762_v43  ;;  %v684_v52 = vmul.f32 %v620_v46, %v556_v40 }
  0xbb   : > { %v1027_v53 = vpop.eup %1026  ;;  %v768_v54 = vmul.f32 1.442695, %v685_v49  ;;  %v623_v55 = vmul.f32 -48.02, %v559_v50 }
  0xbc   : > { %v622_v56 = vmul.f32 -48.02, %v558_v51  ;;  %v1029_v57 = vpop.eup %1028  ;;  %872 = vst.msk [vmem:[%s1254_s20 + $0x68] sm:$0xff] %vm858_vm0, %v1027_v53  ;;  %v766_v58 = vmul.f32 1.442695, %v684_v52  ;;  %v330_v59 = vpop.permute.xlu1 %329 }
  0xbd   : > { %v325_v60 = vpop.permute.xlu0 %324  ;;  %871 = vst.msk [vmem:[%s1254_s20 + $0x60] sm:$0xff] %vm858_vm0, %v1029_v57  ;;  %1038 = vpow2.f32 %v768_v54  ;;  %v687_v61 = vmul.f32 %v623_v55, %v559_v50  ;;  %v561_v63 = vsub.f32 %v330_v59, %v1239_v1 }
  0xbe   : > { %v686_v62 = vmul.f32 %v622_v56, %v558_v51  ;;  %1040 = vpow2.f32 %v766_v58  ;;  %v560_v0 = vsub.f32 %v325_v60, %v1239_v1 }
  0xbf   : > { %v1031_v2 = vpop.eup %1030  ;;  %v772_v3 = vmul.f32 1.442695, %v687_v61  ;;  %v625_v5 = vmul.f32 -48.02, %v561_v63 }
  0xc0   : > { %v770_v4 = vmul.f32 1.442695, %v686_v62  ;;  %v1033_v6 = vpop.eup %1032  ;;  %874 = vst.msk [vmem:[%s1254_s20 + $0x78] sm:$0xff] %vm858_vm0, %v1031_v2  ;;  %v624_v7 = vmul.f32 -48.02, %v560_v0  ;;  %v340_v8 = vpop.permute.xlu1 %339 }
  0xc1   : > { %v335_v9 = vpop.permute.xlu0 %334  ;;  %873 = vst.msk [vmem:[%s1254_s20 + $0x70] sm:$0xff] %vm858_vm0, %v1033_v6  ;;  %1042 = vpow2.f32 %v772_v3  ;;  %v689_v10 = vmul.f32 %v625_v5, %v561_v63  ;;  %v563_v11 = vsub.f32 %v340_v8, %v1239_v1 }
  0xc2   : > { %v562_v12 = vsub.f32 %v335_v9, %v1239_v1  ;;  %1044 = vpow2.f32 %v770_v4  ;;  %v688_v13 = vmul.f32 %v624_v7, %v560_v0 }
  0xc3   : > { %v1035_v14 = vpop.eup %1034  ;;  %v776_v15 = vmul.f32 1.442695, %v689_v10  ;;  %v627_v16 = vmul.f32 -48.02, %v563_v11 }
  0xc4   : > { %v626_v17 = vmul.f32 -48.02, %v562_v12  ;;  %v1037_v18 = vpop.eup %1036  ;;  %876 = vst.msk [vmem:[%s1254_s20 + $0x88] sm:$0xff] %vm858_vm0, %v1035_v14  ;;  %v774_v19 = vmul.f32 1.442695, %v688_v13  ;;  %v350_v20 = vpop.permute.xlu1 %349 }
  0xc5   : > { %v345_v21 = vpop.permute.xlu0 %344  ;;  %875 = vst.msk [vmem:[%s1254_s20 + $0x80] sm:$0xff] %vm858_vm0, %v1037_v18  ;;  %1046 = vpow2.f32 %v776_v15  ;;  %v691_v22 = vmul.f32 %v627_v16, %v563_v11  ;;  %v565_v24 = vsub.f32 %v350_v20, %v1239_v1 }
  0xc6   : > { %v690_v23 = vmul.f32 %v626_v17, %v562_v12  ;;  %1048 = vpow2.f32 %v774_v19  ;;  %v564_v25 = vsub.f32 %v345_v21, %v1239_v1 }
  0xc7   : > { %v1039_v26 = vpop.eup %1038  ;;  %v780_v27 = vmul.f32 1.442695, %v691_v22  ;;  %v629_v29 = vmul.f32 -48.02, %v565_v24 }
  0xc8   : > { %v778_v28 = vmul.f32 1.442695, %v690_v23  ;;  %v1041_v30 = vpop.eup %1040  ;;  %878 = vst.msk [vmem:[%s1254_s20 + $0x98] sm:$0xff] %vm858_vm0, %v1039_v26  ;;  %v628_v31 = vmul.f32 -48.02, %v564_v25  ;;  %v360_v32 = vpop.permute.xlu1 %359 }
  0xc9   : > { %v355_v33 = vpop.permute.xlu0 %354  ;;  %877 = vst.msk [vmem:[%s1254_s20 + $0x90] sm:$0xff] %vm858_vm0, %v1041_v30  ;;  %1050 = vpow2.f32 %v780_v27  ;;  %v693_v34 = vmul.f32 %v629_v29, %v565_v24  ;;  %v567_v35 = vsub.f32 %v360_v32, %v1239_v1 }
  0xca   : > { %v566_v36 = vsub.f32 %v355_v33, %v1239_v1  ;;  %1052 = vpow2.f32 %v778_v28  ;;  %v692_v37 = vmul.f32 %v628_v31, %v564_v25 }
  0xcb   : > { %v1043_v38 = vpop.eup %1042  ;;  %v784_v39 = vmul.f32 1.442695, %v693_v34  ;;  %v631_v40 = vmul.f32 -48.02, %v567_v35 }
  0xcc   : > { %v630_v41 = vmul.f32 -48.02, %v566_v36  ;;  %v1045_v42 = vpop.eup %1044  ;;  %880 = vst.msk [vmem:[%s1254_s20 + $0xa8] sm:$0xff] %vm858_vm0, %v1043_v38  ;;  %v782_v43 = vmul.f32 1.442695, %v692_v37  ;;  %v370_v44 = vpop.permute.xlu1 %369 }
  0xcd   : > { %v365_v45 = vpop.permute.xlu0 %364  ;;  %879 = vst.msk [vmem:[%s1254_s20 + $0xa0] sm:$0xff] %vm858_vm0, %v1045_v42  ;;  %1054 = vpow2.f32 %v784_v39  ;;  %v695_v46 = vmul.f32 %v631_v40, %v567_v35  ;;  %v569_v48 = vsub.f32 %v370_v44, %v1239_v1 }
  0xce   : > { %v694_v47 = vmul.f32 %v630_v41, %v566_v36  ;;  %1056 = vpow2.f32 %v782_v43  ;;  %v568_v49 = vsub.f32 %v365_v45, %v1239_v1 }
  0xcf   : > { %v1047_v50 = vpop.eup %1046  ;;  %v788_v51 = vmul.f32 1.442695, %v695_v46  ;;  %v633_v53 = vmul.f32 -48.02, %v569_v48 }
  0xd0   : > { %v786_v52 = vmul.f32 1.442695, %v694_v47  ;;  %v1049_v54 = vpop.eup %1048  ;;  %882 = vst.msk [vmem:[%s1254_s20 + $0xb8] sm:$0xff] %vm858_vm0, %v1047_v50  ;;  %v632_v55 = vmul.f32 -48.02, %v568_v49  ;;  %v380_v56 = vpop.permute.xlu1 %379 }
  0xd1   : > { %v375_v57 = vpop.permute.xlu0 %374  ;;  %881 = vst.msk [vmem:[%s1254_s20 + $0xb0] sm:$0xff] %vm858_vm0, %v1049_v54  ;;  %1058 = vpow2.f32 %v788_v51  ;;  %v697_v58 = vmul.f32 %v633_v53, %v569_v48  ;;  %v571_v59 = vsub.f32 %v380_v56, %v1239_v1 }
  0xd2   : > { %v570_v60 = vsub.f32 %v375_v57, %v1239_v1  ;;  %1060 = vpow2.f32 %v786_v52  ;;  %v696_v61 = vmul.f32 %v632_v55, %v568_v49 }
  0xd3   : > { %v1051_v62 = vpop.eup %1050  ;;  %v792_v63 = vmul.f32 1.442695, %v697_v58  ;;  %v635_v0 = vmul.f32 -48.02, %v571_v59 }
  0xd4   : > { %v634_v2 = vmul.f32 -48.02, %v570_v60  ;;  %v1053_v3 = vpop.eup %1052  ;;  %884 = vst.msk [vmem:[%s1254_s20 + $0xc8] sm:$0xff] %vm858_vm0, %v1051_v62  ;;  %v790_v4 = vmul.f32 1.442695, %v696_v61  ;;  %v390_v5 = vpop.permute.xlu1 %389 }
  0xd5   : > { %v385_v6 = vpop.permute.xlu0 %384  ;;  %883 = vst.msk [vmem:[%s1254_s20 + $0xc0] sm:$0xff] %vm858_vm0, %v1053_v3  ;;  %1062 = vpow2.f32 %v792_v63  ;;  %v699_v7 = vmul.f32 %v635_v0, %v571_v59  ;;  %v573_v9 = vsub.f32 %v390_v5, %v1239_v1 }
  0xd6   : > { %v698_v8 = vmul.f32 %v634_v2, %v570_v60  ;;  %1064 = vpow2.f32 %v790_v4  ;;  %v572_v10 = vsub.f32 %v385_v6, %v1239_v1 }
  0xd7   : > { %v1055_v11 = vpop.eup %1054  ;;  %v796_v12 = vmul.f32 1.442695, %v699_v7  ;;  %v637_v14 = vmul.f32 -48.02, %v573_v9 }
  0xd8   : > { %v794_v13 = vmul.f32 1.442695, %v698_v8  ;;  %v1057_v15 = vpop.eup %1056  ;;  %886 = vst.msk [vmem:[%s1254_s20 + $0xd8] sm:$0xff] %vm858_vm0, %v1055_v11  ;;  %v636_v16 = vmul.f32 -48.02, %v572_v10  ;;  %v400_v17 = vpop.permute.xlu1 %399 }
  0xd9   : > { %v395_v18 = vpop.permute.xlu0 %394  ;;  %885 = vst.msk [vmem:[%s1254_s20 + $0xd0] sm:$0xff] %vm858_vm0, %v1057_v15  ;;  %1066 = vpow2.f32 %v796_v12  ;;  %v701_v19 = vmul.f32 %v637_v14, %v573_v9  ;;  %v575_v20 = vsub.f32 %v400_v17, %v1239_v1 }
  0xda   : > { %v574_v21 = vsub.f32 %v395_v18, %v1239_v1  ;;  %1068 = vpow2.f32 %v794_v13  ;;  %v700_v22 = vmul.f32 %v636_v16, %v572_v10 }
  0xdb   : > { %v1059_v23 = vpop.eup %1058  ;;  %v800_v24 = vmul.f32 1.442695, %v701_v19  ;;  %v639_v25 = vmul.f32 -48.02, %v575_v20 }
  0xdc   : > { %v638_v26 = vmul.f32 -48.02, %v574_v21  ;;  %v1061_v27 = vpop.eup %1060  ;;  %888 = vst.msk [vmem:[%s1254_s20 + $0xe8] sm:$0xff] %vm858_vm0, %v1059_v23  ;;  %v798_v28 = vmul.f32 1.442695, %v700_v22  ;;  %v410_v29 = vpop.permute.xlu1 %409 }
  0xdd   : > { %v405_v30 = vpop.permute.xlu0 %404  ;;  %887 = vst.msk [vmem:[%s1254_s20 + $0xe0] sm:$0xff] %vm858_vm0, %v1061_v27  ;;  %1070 = vpow2.f32 %v800_v24  ;;  %v703_v31 = vmul.f32 %v639_v25, %v575_v20  ;;  %v577_v33 = vsub.f32 %v410_v29, %v1239_v1 }
  0xde   : > { %v702_v32 = vmul.f32 %v638_v26, %v574_v21  ;;  %1072 = vpow2.f32 %v798_v28  ;;  %v576_v34 = vsub.f32 %v405_v30, %v1239_v1 }
  0xdf   : > { %v1063_v35 = vpop.eup %1062  ;;  %v804_v36 = vmul.f32 1.442695, %v703_v31  ;;  %v641_v38 = vmul.f32 -48.02, %v577_v33 }
  0xe0   : > { %v802_v37 = vmul.f32 1.442695, %v702_v32  ;;  %v1065_v39 = vpop.eup %1064  ;;  %890 = vst.msk [vmem:[%s1254_s20 + $0xf8] sm:$0xff] %vm858_vm0, %v1063_v35  ;;  %v640_v40 = vmul.f32 -48.02, %v576_v34  ;;  %v420_v41 = vpop.permute.xlu1 %419 }
  0xe1   : > { %v415_v42 = vpop.permute.xlu0 %414  ;;  %889 = vst.msk [vmem:[%s1254_s20 + $0xf0] sm:$0xff] %vm858_vm0, %v1065_v39  ;;  %1074 = vpow2.f32 %v804_v36  ;;  %v705_v43 = vmul.f32 %v641_v38, %v577_v33  ;;  %v579_v44 = vsub.f32 %v420_v41, %v1239_v1 }
  0xe2   : > { %v578_v45 = vsub.f32 %v415_v42, %v1239_v1  ;;  %1076 = vpow2.f32 %v802_v37  ;;  %v704_v46 = vmul.f32 %v640_v40, %v576_v34 }
  0xe3   : > { %v1067_v47 = vpop.eup %1066  ;;  %v808_v48 = vmul.f32 1.442695, %v705_v43  ;;  %v643_v49 = vmul.f32 -48.02, %v579_v44 }
  0xe4   : > { %v642_v50 = vmul.f32 -48.02, %v578_v45  ;;  %v1069_v51 = vpop.eup %1068  ;;  %892 = vst.msk [vmem:[%s1254_s20 + $0x108] sm:$0xff] %vm858_vm0, %v1067_v47  ;;  %v806_v52 = vmul.f32 1.442695, %v704_v46  ;;  %v430_v53 = vpop.permute.xlu1 %429 }
  0xe5   : > { %v425_v54 = vpop.permute.xlu0 %424  ;;  %891 = vst.msk [vmem:[%s1254_s20 + $0x100] sm:$0xff] %vm858_vm0, %v1069_v51  ;;  %1078 = vpow2.f32 %v808_v48  ;;  %v707_v55 = vmul.f32 %v643_v49, %v579_v44  ;;  %v581_v57 = vsub.f32 %v430_v53, %v1239_v1 }
  0xe6   : > { %v706_v56 = vmul.f32 %v642_v50, %v578_v45  ;;  %1080 = vpow2.f32 %v806_v52  ;;  %v580_v58 = vsub.f32 %v425_v54, %v1239_v1 }
  0xe7   : > { %v1071_v59 = vpop.eup %1070  ;;  %v812_v60 = vmul.f32 1.442695, %v707_v55  ;;  %v645_v62 = vmul.f32 -48.02, %v581_v57 }
  0xe8   : > { %v810_v61 = vmul.f32 1.442695, %v706_v56  ;;  %v1073_v63 = vpop.eup %1072  ;;  %894 = vst.msk [vmem:[%s1254_s20 + $0x118] sm:$0xff] %vm858_vm0, %v1071_v59  ;;  %v644_v0 = vmul.f32 -48.02, %v580_v58  ;;  %v440_v2 = vpop.permute.xlu1 %439 }
  0xe9   : > { %v435_v3 = vpop.permute.xlu0 %434  ;;  %893 = vst.msk [vmem:[%s1254_s20 + $0x110] sm:$0xff] %vm858_vm0, %v1073_v63  ;;  %1082 = vpow2.f32 %v812_v60  ;;  %v709_v4 = vmul.f32 %v645_v62, %v581_v57  ;;  %v583_v5 = vsub.f32 %v440_v2, %v1239_v1 }
  0xea   : > { %v582_v6 = vsub.f32 %v435_v3, %v1239_v1  ;;  %1084 = vpow2.f32 %v810_v61  ;;  %v708_v7 = vmul.f32 %v644_v0, %v580_v58 }
  0xeb   : > { %v1075_v8 = vpop.eup %1074  ;;  %v816_v9 = vmul.f32 1.442695, %v709_v4  ;;  %v647_v10 = vmul.f32 -48.02, %v583_v5 }
  0xec   : > { %v646_v11 = vmul.f32 -48.02, %v582_v6  ;;  %v1077_v12 = vpop.eup %1076  ;;  %896 = vst.msk [vmem:[%s1254_s20 + $0x128] sm:$0xff] %vm858_vm0, %v1075_v8  ;;  %v814_v13 = vmul.f32 1.442695, %v708_v7  ;;  %v450_v14 = vpop.permute.xlu1 %449 }
  0xed   : > { %v445_v15 = vpop.permute.xlu0 %444  ;;  %895 = vst.msk [vmem:[%s1254_s20 + $0x120] sm:$0xff] %vm858_vm0, %v1077_v12  ;;  %1086 = vpow2.f32 %v816_v9  ;;  %v711_v16 = vmul.f32 %v647_v10, %v583_v5  ;;  %v585_v18 = vsub.f32 %v450_v14, %v1239_v1 }
  0xee   : > { %v710_v17 = vmul.f32 %v646_v11, %v582_v6  ;;  %1088 = vpow2.f32 %v814_v13  ;;  %v584_v19 = vsub.f32 %v445_v15, %v1239_v1 }
  0xef   : > { %v1079_v20 = vpop.eup %1078  ;;  %v820_v21 = vmul.f32 1.442695, %v711_v16  ;;  %v649_v23 = vmul.f32 -48.02, %v585_v18 }
  0xf0   : > { %v818_v22 = vmul.f32 1.442695, %v710_v17  ;;  %v1081_v24 = vpop.eup %1080  ;;  %898 = vst.msk [vmem:[%s1254_s20 + $0x138] sm:$0xff] %vm858_vm0, %v1079_v20  ;;  %v648_v25 = vmul.f32 -48.02, %v584_v19  ;;  %v460_v26 = vpop.permute.xlu1 %459 }
  0xf1   : > { %v455_v27 = vpop.permute.xlu0 %454  ;;  %897 = vst.msk [vmem:[%s1254_s20 + $0x130] sm:$0xff] %vm858_vm0, %v1081_v24  ;;  %1090 = vpow2.f32 %v820_v21  ;;  %v713_v28 = vmul.f32 %v649_v23, %v585_v18  ;;  %v587_v29 = vsub.f32 %v460_v26, %v1239_v1 }
  0xf2   : > { %v586_v30 = vsub.f32 %v455_v27, %v1239_v1  ;;  %1092 = vpow2.f32 %v818_v22  ;;  %v712_v31 = vmul.f32 %v648_v25, %v584_v19 }
  0xf3   : > { %v1083_v32 = vpop.eup %1082  ;;  %v824_v33 = vmul.f32 1.442695, %v713_v28  ;;  %v651_v34 = vmul.f32 -48.02, %v587_v29 }
  0xf4   : > { %v650_v35 = vmul.f32 -48.02, %v586_v30  ;;  %v1085_v36 = vpop.eup %1084  ;;  %900 = vst.msk [vmem:[%s1254_s20 + $0x148] sm:$0xff] %vm858_vm0, %v1083_v32  ;;  %v822_v37 = vmul.f32 1.442695, %v712_v31  ;;  %v470_v38 = vpop.permute.xlu1 %469 }
  0xf5   : > { %v465_v39 = vpop.permute.xlu0 %464  ;;  %899 = vst.msk [vmem:[%s1254_s20 + $0x140] sm:$0xff] %vm858_vm0, %v1085_v36  ;;  %1094 = vpow2.f32 %v824_v33  ;;  %v715_v40 = vmul.f32 %v651_v34, %v587_v29  ;;  %v589_v42 = vsub.f32 %v470_v38, %v1239_v1 }
  0xf6   : > { %v714_v41 = vmul.f32 %v650_v35, %v586_v30  ;;  %1096 = vpow2.f32 %v822_v37  ;;  %v588_v43 = vsub.f32 %v465_v39, %v1239_v1 }
  0xf7   : > { %v1087_v44 = vpop.eup %1086  ;;  %v828_v45 = vmul.f32 1.442695, %v715_v40  ;;  %v653_v47 = vmul.f32 -48.02, %v589_v42 }
  0xf8   : > { %v826_v46 = vmul.f32 1.442695, %v714_v41  ;;  %v1089_v48 = vpop.eup %1088  ;;  %902 = vst.msk [vmem:[%s1254_s20 + $0x158] sm:$0xff] %vm858_vm0, %v1087_v44  ;;  %v652_v49 = vmul.f32 -48.02, %v588_v43  ;;  %v480_v50 = vpop.permute.xlu1 %479 }
  0xf9   : > { %v475_v51 = vpop.permute.xlu0 %474  ;;  %901 = vst.msk [vmem:[%s1254_s20 + $0x150] sm:$0xff] %vm858_vm0, %v1089_v48  ;;  %1098 = vpow2.f32 %v828_v45  ;;  %v717_v52 = vmul.f32 %v653_v47, %v589_v42  ;;  %v591_v53 = vsub.f32 %v480_v50, %v1239_v1 }
  0xfa   : > { %v590_v54 = vsub.f32 %v475_v51, %v1239_v1  ;;  %1100 = vpow2.f32 %v826_v46  ;;  %v716_v55 = vmul.f32 %v652_v49, %v588_v43 }
  0xfb   : > { %v1091_v56 = vpop.eup %1090  ;;  %v832_v57 = vmul.f32 1.442695, %v717_v52  ;;  %v655_v58 = vmul.f32 -48.02, %v591_v53 }
  0xfc   : > { %v654_v59 = vmul.f32 -48.02, %v590_v54  ;;  %v1093_v60 = vpop.eup %1092  ;;  %904 = vst.msk [vmem:[%s1254_s20 + $0x168] sm:$0xff] %vm858_vm0, %v1091_v56  ;;  %v830_v61 = vmul.f32 1.442695, %v716_v55  ;;  %v490_v62 = vpop.permute.xlu1 %489 }
  0xfd   : > { %v485_v63 = vpop.permute.xlu0 %484  ;;  %903 = vst.msk [vmem:[%s1254_s20 + $0x160] sm:$0xff] %vm858_vm0, %v1093_v60  ;;  %1102 = vpow2.f32 %v832_v57  ;;  %v719_v0 = vmul.f32 %v655_v58, %v591_v53  ;;  %v593_v3 = vsub.f32 %v490_v62, %v1239_v1 }
  0xfe   : > { %v718_v2 = vmul.f32 %v654_v59, %v590_v54  ;;  %1104 = vpow2.f32 %v830_v61  ;;  %v592_v4 = vsub.f32 %v485_v63, %v1239_v1 }
  0xff   : > { %v1095_v5 = vpop.eup %1094  ;;  %v836_v6 = vmul.f32 1.442695, %v719_v0  ;;  %v657_v8 = vmul.f32 -48.02, %v593_v3 }
 0x100   : > { %v834_v7 = vmul.f32 1.442695, %v718_v2  ;;  %v1097_v9 = vpop.eup %1096  ;;  %906 = vst.msk [vmem:[%s1254_s20 + $0x178] sm:$0xff] %vm858_vm0, %v1095_v5  ;;  %v656_v10 = vmul.f32 -48.02, %v592_v4  ;;  %v500_v11 = vpop.permute.xlu1 %499 }
 0x101   : > { %v495_v12 = vpop.permute.xlu0 %494  ;;  %905 = vst.msk [vmem:[%s1254_s20 + $0x170] sm:$0xff] %vm858_vm0, %v1097_v9  ;;  %1106 = vpow2.f32 %v836_v6  ;;  %v721_v13 = vmul.f32 %v657_v8, %v593_v3  ;;  %v595_v14 = vsub.f32 %v500_v11, %v1239_v1 }
 0x102   : > { %v594_v15 = vsub.f32 %v495_v12, %v1239_v1  ;;  %1108 = vpow2.f32 %v834_v7  ;;  %v720_v16 = vmul.f32 %v656_v10, %v592_v4 }
 0x103   : > { %v1099_v17 = vpop.eup %1098  ;;  %v840_v18 = vmul.f32 1.442695, %v721_v13  ;;  %v659_v19 = vmul.f32 -48.02, %v595_v14 }
 0x104   : > { %v658_v20 = vmul.f32 -48.02, %v594_v15  ;;  %v1101_v21 = vpop.eup %1100  ;;  %908 = vst.msk [vmem:[%s1254_s20 + $0x188] sm:$0xff] %vm858_vm0, %v1099_v17  ;;  %v838_v22 = vmul.f32 1.442695, %v720_v16  ;;  %v510_v23 = vpop.permute.xlu1 %509 }
 0x105   : > { %v505_v24 = vpop.permute.xlu0 %504  ;;  %907 = vst.msk [vmem:[%s1254_s20 + $0x180] sm:$0xff] %vm858_vm0, %v1101_v21  ;;  %1110 = vpow2.f32 %v840_v18  ;;  %v723_v25 = vmul.f32 %v659_v19, %v595_v14  ;;  %v597_v27 = vsub.f32 %v510_v23, %v1239_v1 }
 0x106   : > { %v722_v26 = vmul.f32 %v658_v20, %v594_v15  ;;  %1112 = vpow2.f32 %v838_v22  ;;  %v596_v28 = vsub.f32 %v505_v24, %v1239_v1 }
 0x107   : > { %v1103_v29 = vpop.eup %1102  ;;  %v844_v30 = vmul.f32 1.442695, %v723_v25  ;;  %v661_v32 = vmul.f32 -48.02, %v597_v27 }
 0x108   : > { %v842_v31 = vmul.f32 1.442695, %v722_v26  ;;  %v1105_v33 = vpop.eup %1104  ;;  %910 = vst.msk [vmem:[%s1254_s20 + $0x198] sm:$0xff] %vm858_vm0, %v1103_v29  ;;  %v660_v34 = vmul.f32 -48.02, %v596_v28  ;;  %v520_v35 = vpop.permute.xlu1 %519 }
 0x109   : > { %v515_v36 = vpop.permute.xlu0 %514  ;;  %909 = vst.msk [vmem:[%s1254_s20 + $0x190] sm:$0xff] %vm858_vm0, %v1105_v33  ;;  %1114 = vpow2.f32 %v844_v30  ;;  %v725_v37 = vmul.f32 %v661_v32, %v597_v27  ;;  %v599_v38 = vsub.f32 %v520_v35, %v1239_v1 }
 0x10a   : > { %v598_v39 = vsub.f32 %v515_v36, %v1239_v1  ;;  %1116 = vpow2.f32 %v842_v31  ;;  %v724_v40 = vmul.f32 %v660_v34, %v596_v28 }
 0x10b   : > { %v1107_v41 = vpop.eup %1106  ;;  %v848_v42 = vmul.f32 1.442695, %v725_v37  ;;  %v663_v43 = vmul.f32 -48.02, %v599_v38 }
 0x10c   : > { %v662_v44 = vmul.f32 -48.02, %v598_v39  ;;  %v1109_v45 = vpop.eup %1108  ;;  %912 = vst.msk [vmem:[%s1254_s20 + $0x1a8] sm:$0xff] %vm858_vm0, %v1107_v41  ;;  %v846_v46 = vmul.f32 1.442695, %v724_v40  ;;  %v530_v47 = vpop.permute.xlu1 %529 }
 0x10d   : > { %v525_v48 = vpop.permute.xlu0 %524  ;;  %911 = vst.msk [vmem:[%s1254_s20 + $0x1a0] sm:$0xff] %vm858_vm0, %v1109_v45  ;;  %1118 = vpow2.f32 %v848_v42  ;;  %v727_v49 = vmul.f32 %v663_v43, %v599_v38  ;;  %v601_v51 = vsub.f32 %v530_v47, %v1239_v1 }
 0x10e   : > { %v726_v50 = vmul.f32 %v662_v44, %v598_v39  ;;  %1120 = vpow2.f32 %v846_v46  ;;  %v600_v52 = vsub.f32 %v525_v48, %v1239_v1 }
 0x10f   : > { %v1111_v53 = vpop.eup %1110  ;;  %v852_v54 = vmul.f32 1.442695, %v727_v49  ;;  %v665_v56 = vmul.f32 -48.02, %v601_v51 }
 0x110   : > { %v850_v55 = vmul.f32 1.442695, %v726_v50  ;;  %v1113_v57 = vpop.eup %1112  ;;  %914 = vst.msk [vmem:[%s1254_s20 + $0x1b8] sm:$0xff] %vm858_vm0, %v1111_v53  ;;  %v664_v58 = vmul.f32 -48.02, %v600_v52 }
 0x111   : > { %913 = vst.msk [vmem:[%s1254_s20 + $0x1b0] sm:$0xff] %vm858_vm0, %v1113_v57  ;;  %1122 = vpow2.f32 %v852_v54  ;;  %v729_v59 = vmul.f32 %v665_v56, %v601_v51 }
 0x112   : > { %1124 = vpow2.f32 %v850_v55  ;;  %v728_v60 = vmul.f32 %v664_v58, %v600_v52 }
 0x113   : > { %v1115_v1 = vpop.eup %1114  ;;  %v856_v61 = vmul.f32 1.442695, %v729_v59 }
 0x114   : > { %v1117_v62 = vpop.eup %1116  ;;  %916 = vst.msk [vmem:[%s1254_s20 + $0x1c8] sm:$0xff] %vm858_vm0, %v1115_v1  ;;  %v854_v63 = vmul.f32 1.442695, %v728_v60 }
 0x115   : > { %915 = vst.msk [vmem:[%s1254_s20 + $0x1c0] sm:$0xff] %vm858_vm0, %v1117_v62  ;;  %1126 = vpow2.f32 %v856_v61 }
 0x116   : > { %1128 = vpow2.f32 %v854_v63 }
 0x117   : > { %v1119_v0 = vpop.eup %1118 }
 0x118   : > { %v1121_v2 = vpop.eup %1120  ;;  %918 = vst.msk [vmem:[%s1254_s20 + $0x1d8] sm:$0xff] %vm858_vm0, %v1119_v0 }
 0x119   : > { %917 = vst.msk [vmem:[%s1254_s20 + $0x1d0] sm:$0xff] %vm858_vm0, %v1121_v2 }
 0x11b   : > { %v1123_v3 = vpop.eup %1122 }
 0x11c   : > { %v1125_v4 = vpop.eup %1124  ;;  %920 = vst.msk [vmem:[%s1254_s20 + $0x1e8] sm:$0xff] %vm858_vm0, %v1123_v3 }
 0x11d   : > { %919 = vst.msk [vmem:[%s1254_s20 + $0x1e0] sm:$0xff] %vm858_vm0, %v1125_v4 }
 0x11f   : > { %v1127_v5 = vpop.eup %1126 }
 0x120   : > { %v1129_v6 = vpop.eup %1128  ;;  %922 = vst.msk [vmem:[%s1254_s20 + $0x1f8] sm:$0xff] %vm858_vm0, %v1127_v5 }
 0x121   : > { %921 = vst.msk [vmem:[%s1254_s20 + $0x1f0] sm:$0xff] %vm858_vm0, %v1129_v6 }
 0x122 PF: > { %s12_s9 = sadd.s32 1, %s1136_s9  }
 0x123   : > { %p9_p4 = scmp.ge.s32.totalorder %s12_s9, 6  }
 0x125   :  { %11 = sbr.rel (!%p9_p4) target bundleno = 1 (0x1), region = 58 }

</bundles_post_ra>
